<compile_context>
chip_gen: v7x
topology: tpu7x:2x2x1
jax: 0.10.0
libtpu: 0.0.40
codegen_flags: <defaults>
</compile_context>

<pallas_src>
import jax
import jax.numpy as jnp
from jax.experimental import pallas as pl
from jax.experimental.pallas import tpu as pltpu


def _mish_kernel(x_ref, o_ref):
    xf = x_ref[...].astype(jnp.float32)
    # Fused tanh(softplus(x)) = ((1+e)^2 - 1) / ((1+e)^2 + 1), e = exp(min(x, 20)).
    # The clamp at 20 matches torch's softplus threshold (softplus(x) == x there,
    # and tanh(x>20) == 1.0 in f32, which the fused form also yields).
    e = jnp.exp(jnp.minimum(xf, 20.0))
    w = (1.0 + e) * (1.0 + e)
    num = w - 1.0
    den = w + 1.0
    r = pl.reciprocal(den, approx=True)
    # Two Newton-Raphson refinements (VPU mul/sub, free under HBM slack) restore
    # full f32 precision while keeping the EUP count at 2 (exp + vrcp).
    r = r * (2.0 - den * r)
    r = r * (2.0 - den * r)
    o_ref[...] = (xf * num * r).astype(o_ref.dtype)


def mish(x: jax.Array, *, target_block_bytes: int = 1 << 20) -> jax.Array:
    """Elementwise Mish via a Pallas TPU kernel. Works for any shape."""
    orig_shape = x.shape
    orig_dtype = x.dtype
    n = x.size
    if n == 0:
        return x

    # Widest lane dim (multiple of 128) that divides n -> lane-dense, pad-free
    # fast path for typical NCHW sizes.
    lanes = 128
    for cand in (1024, 512, 256, 128):
        if n % cand == 0:
            lanes = cand
            break

    rows = pl.cdiv(n, lanes)
    pad = rows * lanes - n
    x_flat = x.reshape(-1)
    if pad:
        # Slow path only when n is not a multiple of 128 (mish(0) == 0, so
        # zero padding is harmless).
        x_flat = jnp.pad(x_flat, (0, pad))
    x2d = x_flat.reshape(rows, lanes)

    # Sublane granularity: 8 rows for 32-bit, 16 for 16-bit, 32 for 8-bit dtypes.
    itemsize = jnp.dtype(orig_dtype).itemsize
    sublane = max(8, 32 // max(itemsize, 1))

    # Row tile: largest multiple of `sublane` giving ~target_block_bytes blocks.
    tile_r = (target_block_bytes // (lanes * itemsize)) // sublane * sublane
    tile_r = max(sublane, tile_r)
    if tile_r >= rows:
        tile_r = rows  # full extent is always layout-legal
    grid = (pl.cdiv(rows, tile_r),)

    out2d = pl.pallas_call(
        _mish_kernel,
        out_shape=jax.ShapeDtypeStruct((rows, lanes), orig_dtype),
        grid_spec=pltpu.PrefetchScalarGridSpec(
            num_scalar_prefetch=0,
            grid=grid,
            in_specs=[pl.BlockSpec((tile_r, lanes), lambda i: (i, 0))],
            out_specs=pl.BlockSpec((tile_r, lanes), lambda i: (i, 0)),
        ),
        compiler_params=pltpu.CompilerParams(
            dimension_semantics=("parallel",),
        ),
    )(x2d)

    out_flat = out2d.reshape(-1)
    if pad:
        out_flat = out_flat[:n]
    return out_flat.reshape(orig_shape)


def mish_ref(x: jax.Array) -> jax.Array:
    xf = x.astype(jnp.float32)
    return (xf * jnp.tanh(jax.nn.softplus(xf))).astype(x.dtype)


if __name__ == "__main__":
    key = jax.random.PRNGKey(0)
    # Small NCHW input consistent with typical use of this activation module.
    x = jax.random.normal(key, (2, 4, 16, 16), dtype=jnp.float32) * 3.0

    y = mish(x)
    y = jax.block_until_ready(y)

    y_ref = mish_ref(x)
    assert y.shape == x.shape and y.dtype == x.dtype
    assert jnp.allclose(y, y_ref, atol=1e-5, rtol=1e-5)

    # Also exercise a non-128-multiple shape (padding slow path) for safety.
    x2 = jax.random.normal(jax.random.PRNGKey(1), (3, 5, 7), dtype=jnp.float32) * 3.0
    y2 = jax.block_until_ready(mish(x2))
    assert jnp.allclose(y2, mish_ref(x2), atol=1e-5, rtol=1e-5)

    print("KERNEL_OK")
</pallas_src>

<mosaic_0001>
module attributes {stable_mosaic.version = 11 : i64} {
  func.func @_mish_kernel(%arg0: i32, %arg1: memref<2x1024xf32, #tpu.memory_space<vmem>>, %arg2: memref<2x1024xf32, #tpu.memory_space<vmem>>) attributes {dimension_semantics = [#tpu.dimension_semantics<parallel>], iteration_bounds = array<i64: 1>, scalar_prefetch = 0 : i64, scratch_operands = 0 : i64, tpu.core_type = #tpu.core_type<tc>, window_params = [{transform_indices = @transform_0, window_bounds = array<i64: 2, 1024>}, {transform_indices = @transform_1, window_bounds = array<i64: 2, 1024>}]} {
    %c0 = arith.constant 0 : index
    %c0_0 = arith.constant 0 : index
    %0 = vector.load %arg1[%c0, %c0_0] : memref<2x1024xf32, #tpu.memory_space<vmem>>, vector<2x1024xf32>
    %cst = arith.constant 2.000000e+01 : f32
    %1 = vector.broadcast %cst : f32 to vector<2x1024xf32>
    %2 = arith.minimumf %0, %1 : vector<2x1024xf32>
    %3 = math.exp %2 : vector<2x1024xf32>
    %cst_1 = arith.constant 1.000000e+00 : f32
    %4 = vector.broadcast %cst_1 : f32 to vector<2x1024xf32>
    %5 = arith.addf %4, %3 : vector<2x1024xf32>
    %cst_2 = arith.constant 1.000000e+00 : f32
    %6 = vector.broadcast %cst_2 : f32 to vector<2x1024xf32>
    %7 = arith.addf %6, %3 : vector<2x1024xf32>
    %8 = arith.mulf %5, %7 : vector<2x1024xf32>
    %cst_3 = arith.constant 1.000000e+00 : f32
    %9 = vector.broadcast %cst_3 : f32 to vector<2x1024xf32>
    %10 = arith.subf %8, %9 : vector<2x1024xf32>
    %cst_4 = arith.constant 1.000000e+00 : f32
    %11 = vector.broadcast %cst_4 : f32 to vector<2x1024xf32>
    %12 = arith.addf %8, %11 : vector<2x1024xf32>
    %13 = tpu.reciprocal %12 {approx = true} : vector<2x1024xf32> -> vector<2x1024xf32>
    %14 = arith.mulf %12, %13 : vector<2x1024xf32>
    %cst_5 = arith.constant 2.000000e+00 : f32
    %15 = vector.broadcast %cst_5 : f32 to vector<2x1024xf32>
    %16 = arith.subf %15, %14 : vector<2x1024xf32>
    %17 = arith.mulf %13, %16 : vector<2x1024xf32>
    %18 = arith.mulf %12, %17 : vector<2x1024xf32>
    %cst_6 = arith.constant 2.000000e+00 : f32
    %19 = vector.broadcast %cst_6 : f32 to vector<2x1024xf32>
    %20 = arith.subf %19, %18 : vector<2x1024xf32>
    %21 = arith.mulf %17, %20 : vector<2x1024xf32>
    %22 = arith.mulf %0, %10 : vector<2x1024xf32>
    %23 = arith.mulf %22, %21 : vector<2x1024xf32>
    %c0_7 = arith.constant 0 : index
    %c0_8 = arith.constant 0 : index
    %24 = vector.load %arg2[%c0_7, %c0_8] : memref<2x1024xf32, #tpu.memory_space<vmem>>, vector<2x1024xf32>
    tpu.vector_store %arg2[%c0_7, %c0_8], %23 {strides = array<i32>} : memref<2x1024xf32, #tpu.memory_space<vmem>>, vector<2x1024xf32>,
    return
  }
  func.func @transform_0(%arg0: i32) -> (i32, i32) {
    %c0_i32 = arith.constant 0 : i32
    %c0_i32_0 = arith.constant 0 : i32
    return %arg0, %c0_i32 : i32, i32
  }
  func.func @transform_1(%arg0: i32) -> (i32, i32) {
    %c0_i32 = arith.constant 0 : i32
    %c0_i32_0 = arith.constant 0 : i32
    return %arg0, %c0_i32 : i32, i32
  }
}

</mosaic_0001>

<bundles_post_ra>
// kernel: tpu_custom_call.1
= control target key start
LH: loop header
LB: loop body
LE: loop exit
PB: predicated region body
PF: predicated region fallthrough
CT: control target
= control target key end

     0   :  { %6 = vsyncpa [#allocation3], 0  ;;  %s168_s0 = inlined_call_operand.hbm [shape: f32[2,1024], index: 0, kind: input, shape index: {}]   ;;  %s169_s1 = inlined_call_operand.hbm [shape: f32[2,1024], index: 1, kind: output, shape index: {}]  }
   0x1   :  { %7 = vsyncpa [#allocation4], 0  ;;  %s132_s6 = smov [#allocation2]   ;;  %s84_s10 = scalar_lea.hbm %s168_s0, 256 }
   0x2   :  { %s14_s7 = sshll.u32 %s132_s6, 4  ;;  %p85_p0 = scmp.ne.s32.totalorder %s168_s0, %s84_s10  ;;  %s15_s7 = int_to_ptr.vmem [resolvable:$true] %s14_s7 }
   0x3   :  { %p88_p1 = scmp.lt.u32.totalorder %s84_s10, %s168_s0 }
   0x5   :  { %p90_p2 = pnand %p88_p1, %p85_p0 }
   0x7   :  { %93 = shalt.err (!%p90_p2)
}
   0x8   :  { %s94_s15 = scalar_lea.vmem %s15_s7, 256  ;;  %p99_p4 = scmp.lt.s32.totalorder %s15_s7, %s15_s7 }
   0x9   :  { %p95_p3 = scmp.ne.s32.totalorder %s15_s7, %s94_s15  ;;  %p100_p5 = scmp.lt.s32.totalorder %s94_s15, %s94_s15 }
   0xb   :  { %p101_p6 = por %p100_p5, %p99_p4 }
   0xd   :  { %p102_p7 = pnand %p101_p6, %p95_p3 }
   0xf   :  { %105 = shalt.err (!%p102_p7)
}
  0x10   :  { %17 = dma.hbm_to_vmem [thread:$0]  %s168_s0, 256, %s15_s7, [#allocation3]  }
  0x11   :  { %128 = dma.done.wait [#allocation3], 256  }
  0x12   :  { %129 = vsyncadd [#allocation3], 4294967040  ;;  %v21_v0 = vld [vmem:[#allocation2] sm:$0xff]  ;;  %v22_v1 = vld [vmem:[#allocation2 + $0x8] sm:$0xff]  ;;  %s133_s0 = smov [#allocation5]  }
  0x13   :  { %v23_v2 = vmin.f32 %v21_v0, 20.0  ;;  %v24_v3 = vmin.f32 %v22_v1, 20.0  ;;  %s63_s18 = sshll.u32 %s133_s0, 4  ;;  %s64_s18 = int_to_ptr.vmem [resolvable:$true] %s63_s18 }
  0x14   :  { %s106_s19 = scalar_lea.vmem %s64_s18, 256  ;;  %p111_p9 = scmp.lt.s32.totalorder %s64_s18, %s64_s18 }
  0x15   :  { %v25_v4 = vmul.f32 1.442695, %v23_v2  ;;  %v27_v5 = vmul.f32 1.442695, %v24_v3  ;;  %p107_p8 = scmp.ne.s32.totalorder %s64_s18, %s106_s19  ;;  %p112_p10 = scmp.lt.s32.totalorder %s106_s19, %s106_s19 }
  0x17   :  { %76 = vpow2.f32 %v25_v4  ;;  %p113_p11 = por %p112_p10, %p111_p9 }
  0x18   :  { %78 = vpow2.f32 %v27_v5 }
  0x19   :  { %p114_p12 = pnand %p113_p11, %p107_p8 }
  0x21   :  { %v77_v6 = vpop.eup %76 }
  0x22   :  { %v79_v7 = vpop.eup %78  ;;  %v29_v8 = vadd.f32 1.0, %v77_v6 }
  0x23   :  { %v30_v9 = vadd.f32 1.0, %v79_v7 }
  0x24   :  { %v31_v10 = vmul.f32 %v29_v8, %v29_v8 }
  0x25   :  { %v32_v11 = vmul.f32 %v30_v9, %v30_v9 }
  0x26   :  { %v35_v12 = vadd.f32 1.0, %v31_v10  ;;  %v72_v20 = vadd.f32 -1.0, %v31_v10 }
  0x27   :  { %v36_v13 = vadd.f32 1.0, %v32_v11  ;;  %v73_v22 = vadd.f32 -1.0, %v32_v11 }
  0x28   :  { %80 = vrcp.f32 %v35_v12  ;;  %v51_v27 = vmul.f32 %v72_v20, %v21_v0 }
  0x29   :  { %82 = vrcp.f32 %v36_v13  ;;  %v52_v29 = vmul.f32 %v73_v22, %v22_v1 }
  0x32   :  { %v81_v14 = vpop.eup %80 }
  0x33   :  { %v83_v15 = vpop.eup %82  ;;  %v39_v16 = vmul.f32 %v81_v14, %v35_v12 }
  0x34   :  { %v40_v17 = vmul.f32 %v83_v15, %v36_v13 }
  0x35   :  { %v41_v18 = vsub.f32 2.0, %v39_v16 }
  0x36   :  { %v42_v19 = vsub.f32 2.0, %v40_v17 }
  0x37   :  { %v43_v21 = vmul.f32 %v81_v14, %v41_v18 }
  0x38   :  { %v44_v23 = vmul.f32 %v83_v15, %v42_v19 }
  0x39   :  { %v45_v24 = vmul.f32 %v43_v21, %v35_v12 }
  0x3a   :  { %v46_v25 = vmul.f32 %v44_v23, %v36_v13 }
  0x3b   :  { %v47_v26 = vsub.f32 2.0, %v45_v24 }
  0x3c   :  { %v48_v28 = vsub.f32 2.0, %v46_v25 }
  0x3d   :  { %v49_v30 = vmul.f32 %v47_v26, %v43_v21 }
  0x3e   :  { %v50_v31 = vmul.f32 %v48_v28, %v44_v23 }
  0x3f   :  { %v53_v32 = vmul.f32 %v51_v27, %v49_v30 }
  0x40   :  { %v54_v33 = vmul.f32 %v52_v29, %v50_v31 }
  0x41   :  { %55 = vst [vmem:[#allocation5] sm:$0xff] %v53_v32 }
  0x42   :  { %56 = vst [vmem:[#allocation5 + $0x8] sm:$0xff] %v54_v33 }
  0x43   :  { %117 = shalt.err (!%p114_p12)
}
  0x44   :  { %s118_s22 = scalar_lea.hbm %s169_s1, 256 }
  0x45   :  { %p119_p13 = scmp.ne.s32.totalorder %s169_s1, %s118_s22  ;;  %p122_p0 = scmp.lt.u32.totalorder %s118_s22, %s169_s1 }
  0x47   :  { %p124_p1 = pnand %p122_p0, %p119_p13 }
  0x49   :  { %127 = shalt.err (!%p124_p1)
}
  0x4a   :  { %66 = dma.vmem_to_hbm [thread:$0]  %s64_s18, 256, %s169_s1, [#allocation4]  }
  0x4b   :  { %130 = dma.done.wait [#allocation4], 256  }
  0x4c   :  { %131 = vsyncadd [#allocation4], 4294967040 }
  0x4d   :  { %70 = vsyncpa [#allocation3], 1 }
  0x4e   :  { %71 = vsyncpa [#allocation4], 1 }

</bundles_post_ra>
